<compile_context>
chip_gen: v7x
topology: tpu7x:2x2x1
jax: 0.10.0
libtpu: 0.0.40
codegen_flags: <defaults>
</compile_context>

<pallas_src>
import functools
import math

import jax
import jax.numpy as jnp
from jax.experimental import pallas as pl
from jax.experimental.pallas import tpu as pltpu


# ----------------------------------------------------------------------------
# Kernel: one (batch, kv_group) tile per grid step.
# ----------------------------------------------------------------------------
def _attention_group_kernel(
    query_ref, kv_ref, wq_ref, bq_ref, wk_ref, bk_ref, wv_ref, bv_ref,
    wo_ref, bo_ref, out_ref, *rest, n_q_per_kv, head_dim, need_weights,
):
    if need_weights:
        probs_ref, acc_ref = rest
    else:
        probs_ref = None
        (acc_ref,) = rest

    g = pl.program_id(1)
    n_groups = pl.num_programs(1)
    nq = n_q_per_kv
    D = head_dim
    in_dtype = query_ref.dtype          # module dtype drives MXU operand dtype

    x = query_ref[0]                    # (Lq, hid)
    y = kv_ref[0]                       # (Lk, hid)
    Lq = x.shape[0]

    # Per-group projections (weights delivered per-group by BlockSpec).
    # Softmax scale is pre-folded into wq/bq, so scores need no extra scaling.
    q_g = (jnp.dot(x, wq_ref[0], preferred_element_type=jnp.float32)
           + bq_ref[0].astype(jnp.float32))                        # (Lq, nq*D) f32
    k_g = (jnp.dot(y, wk_ref[0], preferred_element_type=jnp.float32)
           + bk_ref[0].astype(jnp.float32)).astype(in_dtype)       # (Lk, D)
    v_g = (jnp.dot(y, wv_ref[0], preferred_element_type=jnp.float32)
           + bv_ref[0].astype(jnp.float32)).astype(in_dtype)       # (Lk, D)
    wo_g = wo_ref[0]                                               # (nq*D, hid)

    # Small static loop over the heads of this KV group (k_g / v_g reused).
    contrib = jnp.zeros((Lq, wo_g.shape[1]), jnp.float32)
    for j in range(nq):
        q_h = q_g[:, j * D:(j + 1) * D].astype(in_dtype)           # (Lq, D)

        # q_h @ k_g^T by contracting last dims directly (no XLU transpose).
        s = jax.lax.dot_general(
            q_h, k_g,
            dimension_numbers=(((1,), (1,)), ((), ())),
            preferred_element_type=jnp.float32)                    # (Lq, Lk) f32

        # Softmax in f32 (matches torch: softmax(qk.float())).
        s = s - jnp.max(s, axis=-1, keepdims=True)
        e = jnp.exp(s)
        # approx reciprocal -> EUP slot (error ~1e-3, inside tolerances).
        p = e * pl.reciprocal(jnp.sum(e, axis=-1, keepdims=True), approx=True)

        if need_weights:
            probs_ref[0, j] = p.astype(probs_ref.dtype)

        o_h = jnp.dot(p.astype(in_dtype), v_g,
                      preferred_element_type=jnp.float32)          # (Lq, D) f32
        # Fold head output straight into the output projection (no masked
        # sub-128-lane writes into a merged-heads scratch).
        contrib = contrib + jnp.dot(o_h.astype(in_dtype),
                                    wo_g[j * D:(j + 1) * D, :],
                                    preferred_element_type=jnp.float32)

    # Accumulate output-projection contributions across KV groups.
    @pl.when(g == 0)
    def _():
        acc_ref[...] = contrib + bo_ref[...].astype(jnp.float32)

    @pl.when(g > 0)
    def _():
        acc_ref[...] = acc_ref[...] + contrib

    @pl.when(g == n_groups - 1)
    def _():
        out_ref[0] = acc_ref[...].astype(out_ref.dtype)


# ----------------------------------------------------------------------------
# Parameters (same layout / init style as the PyTorch module's Linear layers).
# ----------------------------------------------------------------------------
class AttentionParams:
    def __init__(self, key, hid_dim, n_head, head_dim, n_kv_head, dtype=jnp.float32):
        self.hid_dim = hid_dim
        self.n_head = n_head
        self.head_dim = head_dim
        self.n_kv_head = n_kv_head
        self.n_q_per_kv = n_head // n_kv_head
        self.scale = 1.0 / math.sqrt(head_dim)

        k1, k2, k3, k4, k5, k6 = jax.random.split(key, 6)
        s = 0.02
        self.wq = (s * jax.random.normal(k1, (hid_dim, n_head * head_dim))).astype(dtype)
        self.bq = (s * jax.random.normal(k2, (n_head * head_dim,))).astype(dtype)
        self.wkv = (s * jax.random.normal(k3, (hid_dim, 2 * n_kv_head * head_dim))).astype(dtype)
        self.bkv = (s * jax.random.normal(k4, (2 * n_kv_head * head_dim,))).astype(dtype)
        self.wo = (s * jax.random.normal(k5, (n_head * head_dim, hid_dim))).astype(dtype)
        self.bo = (s * jax.random.normal(k6, (hid_dim,))).astype(dtype)


# ----------------------------------------------------------------------------
# Module forward: one pallas_call over grid=(B, n_kv_groups).
# ----------------------------------------------------------------------------
def attention_forward(params: AttentionParams, query, kv, need_weights: bool = True):
    B, Lq, hid = query.shape
    _, Lk, _ = kv.shape
    H, KVH, D = params.n_head, params.n_kv_head, params.head_dim
    nq = H // KVH

    # --- Wrapper-side one-off weight prep (tiny; fused away by XLA) ----------
    # Fold the softmax scale into the Q projection (exact in f32; with bf16
    # params this re-quantizes the scaled weights — negligible vs. tolerances).
    wq = (params.wq.astype(jnp.float32) * params.scale).astype(params.wq.dtype)
    bq = (params.bq.astype(jnp.float32) * params.scale).astype(params.bq.dtype)

    # Split fused KV projection into separate K and V weights.
    wk = params.wkv[:, : KVH * D]
    wv = params.wkv[:, KVH * D:]
    bk = params.bkv[: KVH * D]
    bv = params.bkv[KVH * D:]

    # Group-major layouts so each grid step streams only its group's slice and
    # every BlockSpec's trailing dims equal the full array dims.
    wq_g = jnp.transpose(wq.reshape(hid, KVH, nq * D), (1, 0, 2))   # (KVH, hid, nq*D)
    bq_g = bq.reshape(KVH, 1, nq * D)
    wk_g = jnp.transpose(wk.reshape(hid, KVH, D), (1, 0, 2))        # (KVH, hid, D)
    wv_g = jnp.transpose(wv.reshape(hid, KVH, D), (1, 0, 2))
    bk_g = bk.reshape(KVH, 1, D)
    bv_g = bv.reshape(KVH, 1, D)
    wo_g = params.wo.reshape(KVH, nq * D, hid)                      # (KVH, nq*D, hid)
    bo_2d = params.bo.reshape(1, hid)

    kernel = functools.partial(_attention_group_kernel, n_q_per_kv=nq,
                               head_dim=D, need_weights=need_weights)

    out_shapes = [jax.ShapeDtypeStruct((B, Lq, hid), query.dtype)]
    out_specs = [pl.BlockSpec((1, Lq, hid), lambda b, g: (b, 0, 0))]
    if need_weights:
        out_shapes.append(jax.ShapeDtypeStruct((B, H, Lq, Lk), query.dtype))
        out_specs.append(pl.BlockSpec((1, nq, Lq, Lk), lambda b, g: (b, g, 0, 0)))

    # Explicit scoped-VMEM budget derived from block sizes (x2 pipeline buffers,
    # 4x headroom), clamped to v7x's 64 MiB physical VMEM.
    itemsize = jnp.dtype(query.dtype).itemsize
    blk_elems = (Lq * hid + Lk * hid            # activation tiles
                 + hid * nq * D + nq * D        # wq / bq group blocks
                 + 2 * (hid * D + D)            # wk/bk, wv/bv group blocks
                 + nq * D * hid + hid           # wo group block, bo
                 + Lq * hid)                    # output tile
    if need_weights:
        blk_elems += nq * Lq * Lk
    vmem_limit = int(min(64 * 2 ** 20,
                         max(16 * 2 ** 20,
                             4 * (2 * blk_elems * itemsize + Lq * hid * 4))))

    res = pl.pallas_call(
        kernel,
        out_shape=tuple(out_shapes),
        grid_spec=pltpu.PrefetchScalarGridSpec(
            num_scalar_prefetch=0,
            grid=(B, KVH),
            in_specs=[
                pl.BlockSpec((1, Lq, hid), lambda b, g: (b, 0, 0)),      # query
                pl.BlockSpec((1, Lk, hid), lambda b, g: (b, 0, 0)),      # kv
                pl.BlockSpec((1, hid, nq * D), lambda b, g: (g, 0, 0)),  # wq (scaled)
                pl.BlockSpec((1, 1, nq * D), lambda b, g: (g, 0, 0)),    # bq (scaled)
                pl.BlockSpec((1, hid, D), lambda b, g: (g, 0, 0)),       # wk
                pl.BlockSpec((1, 1, D), lambda b, g: (g, 0, 0)),         # bk
                pl.BlockSpec((1, hid, D), lambda b, g: (g, 0, 0)),       # wv
                pl.BlockSpec((1, 1, D), lambda b, g: (g, 0, 0)),         # bv
                pl.BlockSpec((1, nq * D, hid), lambda b, g: (g, 0, 0)),  # wo
                pl.BlockSpec((1, hid), lambda b, g: (0, 0)),             # bo
            ],
            out_specs=tuple(out_specs),
            scratch_shapes=[pltpu.VMEM((Lq, hid), jnp.float32)],         # out accum
        ),
        compiler_params=pltpu.CompilerParams(
            dimension_semantics=("parallel", "arbitrary"),
            vmem_limit_bytes=vmem_limit,
        ),
    )(query, kv, wq_g, bq_g, wk_g, bk_g, wv_g, bv_g, wo_g, bo_2d)

    if need_weights:
        out, probs = res
        return out, probs
    out = res[0] if isinstance(res, (tuple, list)) else res
    return out, None


# ----------------------------------------------------------------------------
# Pure-JAX reference (mirrors the PyTorch module) for a sanity check.
# ----------------------------------------------------------------------------
def _reference_forward(params: AttentionParams, query, kv):
    B, Lq, hid = query.shape
    _, Lk, _ = kv.shape
    H, KVH, D = params.n_head, params.n_kv_head, params.head_dim
    nq = H // KVH

    q = query @ params.wq + params.bq
    kvp = kv @ params.wkv + params.bkv
    k, v = jnp.split(kvp, 2, axis=-1)

    q = q.reshape(B, Lq, H, D).transpose(0, 2, 1, 3)
    k = k.reshape(B, Lk, KVH, D)
    v = v.reshape(B, Lk, KVH, D)
    k = jnp.repeat(k, nq, axis=2).transpose(0, 2, 1, 3)   # repeat_interleave
    v = jnp.repeat(v, nq, axis=2).transpose(0, 2, 1, 3)

    s = jnp.einsum('bhqd,bhkd->bhqk', q, k) * params.scale
    p = jax.nn.softmax(s.astype(jnp.float32), axis=-1).astype(q.dtype)
    o = jnp.einsum('bhqk,bhkd->bhqd', p, v)
    o = o.transpose(0, 2, 1, 3).reshape(B, Lq, H * D)
    out = o @ params.wo + params.bo
    return out, p


if __name__ == "__main__":
    key = jax.random.PRNGKey(0)
    k_param, k_q, k_kv = jax.random.split(key, 3)

    # Small config consistent with the module:
    #   hidDim=32, nHead=4, headDim=16, nKVHead=2 (nQPerKvHead=2), scale=1/sqrt(headDim)
    B, Lq, Lk, hid = 2, 8, 8, 32
    params = AttentionParams(k_param, hid_dim=hid, n_head=4, head_dim=16, n_kv_head=2)

    query = jax.random.normal(k_q, (B, Lq, hid), dtype=jnp.float32)
    kv_in = jax.random.normal(k_kv, (B, Lk, hid), dtype=jnp.float32)

    # need_weights=True path (returns attention probabilities, like the module).
    out, attn_w = attention_forward(params, query, kv_in, need_weights=True)
    jax.block_until_ready(out)
    jax.block_until_ready(attn_w)
    assert out.shape == (B, Lq, hid)
    assert attn_w.shape == (B, params.n_head, Lq, Lk)

    # need_weights=False path (skips the probs HBM write entirely).
    out_nw, none_w = attention_forward(params, query, kv_in, need_weights=False)
    jax.block_until_ready(out_nw)
    assert none_w is None

    # Numerical sanity check vs the pure-JAX reference.
    ref_out, ref_w = _reference_forward(params, query, kv_in)
    assert jnp.allclose(out, ref_out, atol=1e-2, rtol=1e-2)
    assert jnp.allclose(attn_w, ref_w, atol=1e-2, rtol=1e-2)
    assert jnp.allclose(out_nw, ref_out, atol=1e-2, rtol=1e-2)

    print("KERNEL_OK")
</pallas_src>

<mosaic_0001>
module attributes {stable_mosaic.version = 11 : i64} {
  func.func @_attention_group_kernel(%arg0: i32, %arg1: i32, %arg2: memref<1x8x32xf32, #tpu.memory_space<vmem>>, %arg3: memref<1x8x32xf32, #tpu.memory_space<vmem>>, %arg4: memref<1x32x32xf32, #tpu.memory_space<vmem>>, %arg5: memref<1x1x32xf32, #tpu.memory_space<vmem>>, %arg6: memref<1x32x16xf32, #tpu.memory_space<vmem>>, %arg7: memref<1x1x16xf32, #tpu.memory_space<vmem>>, %arg8: memref<1x32x16xf32, #tpu.memory_space<vmem>>, %arg9: memref<1x1x16xf32, #tpu.memory_space<vmem>>, %arg10: memref<1x32x32xf32, #tpu.memory_space<vmem>>, %arg11: memref<1x32xf32, #tpu.memory_space<vmem>>, %arg12: memref<1x8x32xf32, #tpu.memory_space<vmem>>, %arg13: memref<1x2x8x8xf32, #tpu.memory_space<vmem>>, %arg14: memref<8x32xf32, #tpu.memory_space<vmem>>) attributes {dimension_semantics = [#tpu.dimension_semantics<parallel>, #tpu.dimension_semantics<arbitrary>], iteration_bounds = array<i64: 2, 2>, scalar_prefetch = 0 : i64, scratch_operands = 1 : i64, tpu.core_type = #tpu.core_type<tc>, window_params = [{transform_indices = @transform_0, window_bounds = array<i64: 1, 8, 32>}, {transform_indices = @transform_1, window_bounds = array<i64: 1, 8, 32>}, {transform_indices = @transform_2, window_bounds = array<i64: 1, 32, 32>}, {transform_indices = @transform_3, window_bounds = array<i64: 1, 1, 32>}, {transform_indices = @transform_4, window_bounds = array<i64: 1, 32, 16>}, {transform_indices = @transform_5, window_bounds = array<i64: 1, 1, 16>}, {transform_indices = @transform_6, window_bounds = array<i64: 1, 32, 16>}, {transform_indices = @transform_7, window_bounds = array<i64: 1, 1, 16>}, {transform_indices = @transform_8, window_bounds = array<i64: 1, 32, 32>}, {pipeline_mode = #tpu.pipeline_mode<synchronous>, transform_indices = @transform_9, window_bounds = array<i64: 1, 32>}, {transform_indices = @transform_10, window_bounds = array<i64: 1, 8, 32>}, {transform_indices = @transform_11, window_bounds = array<i64: 1, 2, 8, 8>}]} {
    %c0 = arith.constant 0 : index
    %c0_0 = arith.constant 0 : index
    %c0_1 = arith.constant 0 : index
    %0 = vector.load %arg2[%c0, %c0_0, %c0_1] : memref<1x8x32xf32, #tpu.memory_space<vmem>>, vector<1x8x32xf32>
    %1 = vector.shape_cast %0 : vector<1x8x32xf32> to vector<8x32xf32>
    %c0_2 = arith.constant 0 : index
    %c0_3 = arith.constant 0 : index
    %c0_4 = arith.constant 0 : index
    %2 = vector.load %arg3[%c0_2, %c0_3, %c0_4] : memref<1x8x32xf32, #tpu.memory_space<vmem>>, vector<1x8x32xf32>
    %3 = vector.shape_cast %2 : vector<1x8x32xf32> to vector<8x32xf32>
    %c0_5 = arith.constant 0 : index
    %c0_6 = arith.constant 0 : index
    %c0_7 = arith.constant 0 : index
    %4 = vector.load %arg4[%c0_5, %c0_6, %c0_7] : memref<1x32x32xf32, #tpu.memory_space<vmem>>, vector<1x32x32xf32>
    %5 = vector.shape_cast %4 : vector<1x32x32xf32> to vector<32x32xf32>
    %cst = arith.constant dense<0.000000e+00> : vector<8x32xf32>
    %6 = tpu.matmul %1, %5, %cst {dimension_numbers = #tpu.dot_dimension_numbers<[1], [0], [0], [1], [0, 0, 1, 1], [], []>} : vector<8x32xf32>, vector<32x32xf32>, vector<8x32xf32> -> vector<8x32xf32>
    %c0_8 = arith.constant 0 : index
    %c0_9 = arith.constant 0 : index
    %c0_10 = arith.constant 0 : index
    %7 = vector.load %arg5[%c0_8, %c0_9, %c0_10] : memref<1x1x32xf32, #tpu.memory_space<vmem>>, vector<1x1x32xf32>
    %8 = vector.shape_cast %7 : vector<1x1x32xf32> to vector<1x32xf32>
    %9 = vector.broadcast %8 : vector<1x32xf32> to vector<8x32xf32>
    %10 = arith.addf %6, %9 : vector<8x32xf32>
    %c0_11 = arith.constant 0 : index
    %c0_12 = arith.constant 0 : index
    %c0_13 = arith.constant 0 : index
    %11 = vector.load %arg6[%c0_11, %c0_12, %c0_13] : memref<1x32x16xf32, #tpu.memory_space<vmem>>, vector<1x32x16xf32>
    %12 = vector.shape_cast %11 : vector<1x32x16xf32> to vector<32x16xf32>
    %cst_14 = arith.constant dense<0.000000e+00> : vector<8x16xf32>
    %13 = tpu.matmul %3, %12, %cst_14 {dimension_numbers = #tpu.dot_dimension_numbers<[1], [0], [0], [1], [0, 0, 1, 1], [], []>} : vector<8x32xf32>, vector<32x16xf32>, vector<8x16xf32> -> vector<8x16xf32>
    %c0_15 = arith.constant 0 : index
    %c0_16 = arith.constant 0 : index
    %c0_17 = arith.constant 0 : index
    %14 = vector.load %arg7[%c0_15, %c0_16, %c0_17] : memref<1x1x16xf32, #tpu.memory_space<vmem>>, vector<1x1x16xf32>
    %15 = vector.shape_cast %14 : vector<1x1x16xf32> to vector<1x16xf32>
    %16 = vector.broadcast %15 : vector<1x16xf32> to vector<8x16xf32>
    %17 = arith.addf %13, %16 : vector<8x16xf32>
    %c0_18 = arith.constant 0 : index
    %c0_19 = arith.constant 0 : index
    %c0_20 = arith.constant 0 : index
    %18 = vector.load %arg8[%c0_18, %c0_19, %c0_20] : memref<1x32x16xf32, #tpu.memory_space<vmem>>, vector<1x32x16xf32>
    %19 = vector.shape_cast %18 : vector<1x32x16xf32> to vector<32x16xf32>
    %cst_21 = arith.constant dense<0.000000e+00> : vector<8x16xf32>
    %20 = tpu.matmul %3, %19, %cst_21 {dimension_numbers = #tpu.dot_dimension_numbers<[1], [0], [0], [1], [0, 0, 1, 1], [], []>} : vector<8x32xf32>, vector<32x16xf32>, vector<8x16xf32> -> vector<8x16xf32>
    %c0_22 = arith.constant 0 : index
    %c0_23 = arith.constant 0 : index
    %c0_24 = arith.constant 0 : index
    %21 = vector.load %arg9[%c0_22, %c0_23, %c0_24] : memref<1x1x16xf32, #tpu.memory_space<vmem>>, vector<1x1x16xf32>
    %22 = vector.shape_cast %21 : vector<1x1x16xf32> to vector<1x16xf32>
    %23 = vector.broadcast %22 : vector<1x16xf32> to vector<8x16xf32>
    %24 = arith.addf %20, %23 : vector<8x16xf32>
    %c0_25 = arith.constant 0 : index
    %c0_26 = arith.constant 0 : index
    %c0_27 = arith.constant 0 : index
    %25 = vector.load %arg10[%c0_25, %c0_26, %c0_27] : memref<1x32x32xf32, #tpu.memory_space<vmem>>, vector<1x32x32xf32>
    %26 = vector.shape_cast %25 : vector<1x32x32xf32> to vector<32x32xf32>
    %cst_28 = arith.constant 0.000000e+00 : f32
    %27 = vector.broadcast %cst_28 : f32 to vector<8x32xf32>
    %28 = vector.extract_strided_slice %10 {offsets = [0, 0], sizes = [8, 16], strides = [1, 1]} : vector<8x32xf32> to vector<8x16xf32>
    %cst_29 = arith.constant dense<0.000000e+00> : vector<8x8xf32>
    %29 = tpu.matmul %28, %17, %cst_29 {dimension_numbers = #tpu.dot_dimension_numbers<[1], [1], [0], [0], [0, 0, 1, 0], [], []>} : vector<8x16xf32>, vector<8x16xf32>, vector<8x8xf32> -> vector<8x8xf32>
    %cst_30 = arith.constant dense<0xFF800000> : vector<8xf32>
    %30 = vector.multi_reduction <maximumf>, %29, %cst_30 [1] : vector<8x8xf32> to vector<8xf32>
    %31 = vector.shape_cast %30 : vector<8xf32> to vector<8x1xf32>
    %32 = vector.broadcast %31 : vector<8x1xf32> to vector<8x8xf32>
    %33 = arith.subf %29, %32 : vector<8x8xf32>
    %34 = math.exp %33 : vector<8x8xf32>
    %cst_31 = arith.constant dense<0.000000e+00> : vector<8xf32>
    %35 = vector.multi_reduction <add>, %34, %cst_31 [1] : vector<8x8xf32> to vector<8xf32>
    %36 = vector.shape_cast %35 : vector<8xf32> to vector<8x1xf32>
    %37 = tpu.reciprocal %36 {approx = true} : vector<8x1xf32> -> vector<8x1xf32>
    %38 = vector.broadcast %37 : vector<8x1xf32> to vector<8x8xf32>
    %39 = arith.mulf %34, %38 : vector<8x8xf32>
    %c0_32 = arith.constant 0 : index
    %c0_33 = arith.constant 0 : index
    %c0_34 = arith.constant 0 : index
    %c0_35 = arith.constant 0 : index
    %40 = vector.load %arg13[%c0_32, %c0_33, %c0_34, %c0_35] : memref<1x2x8x8xf32, #tpu.memory_space<vmem>>, vector<1x1x8x8xf32>
    %41 = vector.shape_cast %40 : vector<1x1x8x8xf32> to vector<8x8xf32>
    %42 = vector.shape_cast %39 : vector<8x8xf32> to vector<1x1x8x8xf32>
    tpu.vector_store %arg13[%c0_32, %c0_33, %c0_34, %c0_35], %42 {strides = array<i32>} : memref<1x2x8x8xf32, #tpu.memory_space<vmem>>, vector<1x1x8x8xf32>,
    %cst_36 = arith.constant dense<0.000000e+00> : vector<8x16xf32>
    %43 = tpu.matmul %39, %24, %cst_36 {dimension_numbers = #tpu.dot_dimension_numbers<[1], [0], [0], [1], [0, 0, 1, 1], [], []>} : vector<8x8xf32>, vector<8x16xf32>, vector<8x16xf32> -> vector<8x16xf32>
    %44 = vector.extract_strided_slice %26 {offsets = [0, 0], sizes = [16, 32], strides = [1, 1]} : vector<32x32xf32> to vector<16x32xf32>
    %cst_37 = arith.constant dense<0.000000e+00> : vector<8x32xf32>
    %45 = tpu.matmul %43, %44, %cst_37 {dimension_numbers = #tpu.dot_dimension_numbers<[1], [0], [0], [1], [0, 0, 1, 1], [], []>} : vector<8x16xf32>, vector<16x32xf32>, vector<8x32xf32> -> vector<8x32xf32>
    %46 = arith.addf %27, %45 : vector<8x32xf32>
    %47 = vector.extract_strided_slice %10 {offsets = [0, 16], sizes = [8, 16], strides = [1, 1]} : vector<8x32xf32> to vector<8x16xf32>
    %cst_38 = arith.constant dense<0.000000e+00> : vector<8x8xf32>
    %48 = tpu.matmul %47, %17, %cst_38 {dimension_numbers = #tpu.dot_dimension_numbers<[1], [1], [0], [0], [0, 0, 1, 0], [], []>} : vector<8x16xf32>, vector<8x16xf32>, vector<8x8xf32> -> vector<8x8xf32>
    %cst_39 = arith.constant dense<0xFF800000> : vector<8xf32>
    %49 = vector.multi_reduction <maximumf>, %48, %cst_39 [1] : vector<8x8xf32> to vector<8xf32>
    %50 = vector.shape_cast %49 : vector<8xf32> to vector<8x1xf32>
    %51 = vector.broadcast %50 : vector<8x1xf32> to vector<8x8xf32>
    %52 = arith.subf %48, %51 : vector<8x8xf32>
    %53 = math.exp %52 : vector<8x8xf32>
    %cst_40 = arith.constant dense<0.000000e+00> : vector<8xf32>
    %54 = vector.multi_reduction <add>, %53, %cst_40 [1] : vector<8x8xf32> to vector<8xf32>
    %55 = vector.shape_cast %54 : vector<8xf32> to vector<8x1xf32>
    %56 = tpu.reciprocal %55 {approx = true} : vector<8x1xf32> -> vector<8x1xf32>
    %57 = vector.broadcast %56 : vector<8x1xf32> to vector<8x8xf32>
    %58 = arith.mulf %53, %57 : vector<8x8xf32>
    %c0_41 = arith.constant 0 : index
    %c1 = arith.constant 1 : index
    %c0_42 = arith.constant 0 : index
    %c0_43 = arith.constant 0 : index
    %59 = vector.load %arg13[%c0_41, %c1, %c0_42, %c0_43] : memref<1x2x8x8xf32, #tpu.memory_space<vmem>>, vector<1x1x8x8xf32>
    %60 = vector.shape_cast %59 : vector<1x1x8x8xf32> to vector<8x8xf32>
    %61 = vector.shape_cast %58 : vector<8x8xf32> to vector<1x1x8x8xf32>
    tpu.vector_store %arg13[%c0_41, %c1, %c0_42, %c0_43], %61 {strides = array<i32>} : memref<1x2x8x8xf32, #tpu.memory_space<vmem>>, vector<1x1x8x8xf32>,
    %cst_44 = arith.constant dense<0.000000e+00> : vector<8x16xf32>
    %62 = tpu.matmul %58, %24, %cst_44 {dimension_numbers = #tpu.dot_dimension_numbers<[1], [0], [0], [1], [0, 0, 1, 1], [], []>} : vector<8x8xf32>, vector<8x16xf32>, vector<8x16xf32> -> vector<8x16xf32>
    %63 = vector.extract_strided_slice %26 {offsets = [16, 0], sizes = [16, 32], strides = [1, 1]} : vector<32x32xf32> to vector<16x32xf32>
    %cst_45 = arith.constant dense<0.000000e+00> : vector<8x32xf32>
    %64 = tpu.matmul %62, %63, %cst_45 {dimension_numbers = #tpu.dot_dimension_numbers<[1], [0], [0], [1], [0, 0, 1, 1], [], []>} : vector<8x16xf32>, vector<16x32xf32>, vector<8x32xf32> -> vector<8x32xf32>
    %65 = arith.addf %46, %64 : vector<8x32xf32>
    %c0_i32 = arith.constant 0 : i32
    %66 = arith.cmpi eq, %arg1, %c0_i32 : i32
    %67 = arith.extui %66 : i1 to i32
    %c0_i32_46 = arith.constant 0 : i32
    %68 = arith.cmpi ne, %67, %c0_i32_46 : i32
    scf.if %68 {
      %c0_50 = arith.constant 0 : index
      %c0_51 = arith.constant 0 : index
      %75 = vector.load %arg11[%c0_50, %c0_51] : memref<1x32xf32, #tpu.memory_space<vmem>>, vector<1x32xf32>
      %76 = vector.broadcast %75 : vector<1x32xf32> to vector<8x32xf32>
      %77 = arith.addf %65, %76 : vector<8x32xf32>
      %c0_52 = arith.constant 0 : index
      %c0_53 = arith.constant 0 : index
      %78 = vector.load %arg14[%c0_52, %c0_53] : memref<8x32xf32, #tpu.memory_space<vmem>>, vector<8x32xf32>
      tpu.vector_store %arg14[%c0_52, %c0_53], %77 {strides = array<i32>} : memref<8x32xf32, #tpu.memory_space<vmem>>, vector<8x32xf32>,
    } else {
    }
    %c0_i32_47 = arith.constant 0 : i32
    %69 = arith.cmpi sgt, %arg1, %c0_i32_47 : i32
    %70 = arith.extui %69 : i1 to i32
    %c0_i32_48 = arith.constant 0 : i32
    %71 = arith.cmpi ne, %70, %c0_i32_48 : i32
    scf.if %71 {
      %c0_50 = arith.constant 0 : index
      %c0_51 = arith.constant 0 : index
      %75 = vector.load %arg14[%c0_50, %c0_51] : memref<8x32xf32, #tpu.memory_space<vmem>>, vector<8x32xf32>
      %76 = arith.addf %75, %65 : vector<8x32xf32>
      %c0_52 = arith.constant 0 : index
      %c0_53 = arith.constant 0 : index
      %77 = vector.load %arg14[%c0_52, %c0_53] : memref<8x32xf32, #tpu.memory_space<vmem>>, vector<8x32xf32>
      tpu.vector_store %arg14[%c0_52, %c0_53], %76 {strides = array<i32>} : memref<8x32xf32, #tpu.memory_space<vmem>>, vector<8x32xf32>,
    } else {
    }
    %c1_i32 = arith.constant 1 : i32
    %72 = arith.cmpi eq, %arg1, %c1_i32 : i32
    %73 = arith.extui %72 : i1 to i32
    %c0_i32_49 = arith.constant 0 : i32
    %74 = arith.cmpi ne, %73, %c0_i32_49 : i32
    scf.if %74 {
      %c0_50 = arith.constant 0 : index
      %c0_51 = arith.constant 0 : index
      %75 = vector.load %arg14[%c0_50, %c0_51] : memref<8x32xf32, #tpu.memory_space<vmem>>, vector<8x32xf32>
      %c0_52 = arith.constant 0 : index
      %c0_53 = arith.constant 0 : index
      %c0_54 = arith.constant 0 : index
      %76 = vector.load %arg12[%c0_52, %c0_53, %c0_54] : memref<1x8x32xf32, #tpu.memory_space<vmem>>, vector<1x8x32xf32>
      %77 = vector.shape_cast %76 : vector<1x8x32xf32> to vector<8x32xf32>
      %78 = vector.shape_cast %75 : vector<8x32xf32> to vector<1x8x32xf32>
      tpu.vector_store %arg12[%c0_52, %c0_53, %c0_54], %78 {strides = array<i32>} : memref<1x8x32xf32, #tpu.memory_space<vmem>>, vector<1x8x32xf32>,
    } else {
    }
    return
  }
  func.func @transform_0(%arg0: i32, %arg1: i32) -> (i32, i32, i32) {
    %c0_i32 = arith.constant 0 : i32
    %c0_i32_0 = arith.constant 0 : i32
    %c0_i32_1 = arith.constant 0 : i32
    return %arg0, %c0_i32, %c0_i32_0 : i32, i32, i32
  }
  func.func @transform_1(%arg0: i32, %arg1: i32) -> (i32, i32, i32) {
    %c0_i32 = arith.constant 0 : i32
    %c0_i32_0 = arith.constant 0 : i32
    %c0_i32_1 = arith.constant 0 : i32
    return %arg0, %c0_i32, %c0_i32_0 : i32, i32, i32
  }
  func.func @transform_2(%arg0: i32, %arg1: i32) -> (i32, i32, i32) {
    %c0_i32 = arith.constant 0 : i32
    %c0_i32_0 = arith.constant 0 : i32
    %c0_i32_1 = arith.constant 0 : i32
    return %arg1, %c0_i32, %c0_i32_0 : i32, i32, i32
  }
  func.func @transform_3(%arg0: i32, %arg1: i32) -> (i32, i32, i32) {
    %c0_i32 = arith.constant 0 : i32
    %c0_i32_0 = arith.constant 0 : i32
    %c0_i32_1 = arith.constant 0 : i32
    return %arg1, %c0_i32, %c0_i32_0 : i32, i32, i32
  }
  func.func @transform_4(%arg0: i32, %arg1: i32) -> (i32, i32, i32) {
    %c0_i32 = arith.constant 0 : i32
    %c0_i32_0 = arith.constant 0 : i32
    %c0_i32_1 = arith.constant 0 : i32
    return %arg1, %c0_i32, %c0_i32_0 : i32, i32, i32
  }
  func.func @transform_5(%arg0: i32, %arg1: i32) -> (i32, i32, i32) {
    %c0_i32 = arith.constant 0 : i32
    %c0_i32_0 = arith.constant 0 : i32
    %c0_i32_1 = arith.constant 0 : i32
    return %arg1, %c0_i32, %c0_i32_0 : i32, i32, i32
  }
  func.func @transform_6(%arg0: i32, %arg1: i32) -> (i32, i32, i32) {
    %c0_i32 = arith.constant 0 : i32
    %c0_i32_0 = arith.constant 0 : i32
    %c0_i32_1 = arith.constant 0 : i32
    return %arg1, %c0_i32, %c0_i32_0 : i32, i32, i32
  }
  func.func @transform_7(%arg0: i32, %arg1: i32) -> (i32, i32, i32) {
    %c0_i32 = arith.constant 0 : i32
    %c0_i32_0 = arith.constant 0 : i32
    %c0_i32_1 = arith.constant 0 : i32
    return %arg1, %c0_i32, %c0_i32_0 : i32, i32, i32
  }
  func.func @transform_8(%arg0: i32, %arg1: i32) -> (i32, i32, i32) {
    %c0_i32 = arith.constant 0 : i32
    %c0_i32_0 = arith.constant 0 : i32
    %c0_i32_1 = arith.constant 0 : i32
    return %arg1, %c0_i32, %c0_i32_0 : i32, i32, i32
  }
  func.func @transform_9(%arg0: i32, %arg1: i32) -> (i32, i32) {
    %c0_i32 = arith.constant 0 : i32
    %c0_i32_0 = arith.constant 0 : i32
    %c0_i32_1 = arith.constant 0 : i32
    return %c0_i32, %c0_i32_0 : i32, i32
  }
  func.func @transform_10(%arg0: i32, %arg1: i32) -> (i32, i32, i32) {
    %c0_i32 = arith.constant 0 : i32
    %c0_i32_0 = arith.constant 0 : i32
    %c0_i32_1 = arith.constant 0 : i32
    return %arg0, %c0_i32, %c0_i32_0 : i32, i32, i32
  }
  func.func @transform_11(%arg0: i32, %arg1: i32) -> (i32, i32, i32, i32) {
    %c0_i32 = arith.constant 0 : i32
    %c0_i32_0 = arith.constant 0 : i32
    %c0_i32_1 = arith.constant 0 : i32
    return %arg0, %arg1, %c0_i32, %c0_i32_0 : i32, i32, i32, i32
  }
}

</mosaic_0001>

<bundles_post_ra>
// kernel: tpu_custom_call.1
= control target key start
LH: loop header
LB: loop body
LE: loop exit
PB: predicated region body
PF: predicated region fallthrough
CT: control target
= control target key end

     0   :  { %s2362_s0 = inlined_call_operand.vmem [shape: f32[2,8,32], index: 0, kind: input, shape index: {}]   ;;  %s2363_s1 = inlined_call_operand.vmem [shape: f32[2,8,32], index: 1, kind: input, shape index: {}]   ;;  %s2364_s2 = inlined_call_operand.vmem [shape: f32[2,32,32], index: 2, kind: input, shape index: {}]   ;;  %s2365_s3 = inlined_call_operand.vmem [shape: f32[2,1,32], index: 3, kind: input, shape index: {}]   ;;  %s2366_s4 = inlined_call_operand.vmem [shape: f32[2,32,16], index: 4, kind: input, shape index: {}]   ;;  %s2367_s5 = inlined_call_operand.vmem [shape: f32[2,1,16], index: 5, kind: input, shape index: {}]   ;;  %s2368_s6 = inlined_call_operand.vmem [shape: f32[2,32,16], index: 6, kind: input, shape index: {}]   ;;  %s2369_s7 = inlined_call_operand.vmem [shape: f32[2,1,16], index: 7, kind: input, shape index: {}]   ;;  %s2370_s8 = inlined_call_operand.vmem [shape: f32[2,32,32], index: 8, kind: input, shape index: {}]   ;;  %s2371_s9 = inlined_call_operand.vmem [shape: f32[1,32], index: 9, kind: input, shape index: {}]   ;;  %s2372_s10 = inlined_call_operand.hbm [shape: f32[2,8,32], index: 10, kind: output, shape index: {0}]   ;;  %s2373_s11 = inlined_call_operand.hbm [shape: f32[2,4,8,8], index: 11, kind: output, shape index: {1}]  }
   0x1   :  { %2386 = sst [smem:[#allocation17_spill]] %s2362_s0 }
   0x2   :  { %2387 = sst [smem:[#allocation18_spill]] %s2363_s1 }
   0x3   :  { %2388 = sst [smem:[#allocation19_spill]] %s2364_s2 }
   0x4   :  { %2389 = sst [smem:[#allocation20_spill]] %s2365_s3 }
   0x5   :  { %2390 = sst [smem:[#allocation21_spill]] %s2366_s4 }
   0x6   :  { %2391 = sst [smem:[#allocation22_spill]] %s2367_s5 }
   0x7   :  { %2392 = sst [smem:[#allocation23_spill]] %s2371_s9 }
   0x8   :  { %2393 = sst [smem:[#allocation24_spill]] %s2372_s10 }
   0x9   :  { %2394 = sst [smem:[#allocation25_spill]] %s2373_s11 }
   0xa   :  { %17 = vsyncpa [#allocation4], 0 }
   0xb   :  { %19 = vsyncpa [#allocation4 + $0x1], 0 }
   0xc   :  { %20 = vsyncpa [#allocation6], 0 }
   0xd   :  { %22 = vsyncpa [#allocation6 + $0x1], 0  ;;  %s2031_s17 = smov 0   ;;  %s2033_s18 = smov 0  }
   0xe   :  { %s2035_s19 = smov 0   ;;  %s2037_s20 = smov 0  }
   0xf   :  { %s2039_s21 = smov 0   ;;  %s2041_s22 = smov 0  }
  0x10   :  { %s2043_s23 = smov 0   ;;  %s2045_s24 = smov 0  }
  0x11   :  { %s2047_s25 = smov 0   ;;  %s2049_s26 = smov 0  }
  0x12   :  { %s2051_s27 = smov 0  }
  0x13 LB: > { %2395 = sst [smem:[#allocation9_spill]] %s1933_s20  ;;  %s1527_s28 = sadd.s32 4294967295, %s1961_s27   ;;  %s1961_s27 = sphi %s2051_s27, %s28_s27   ;;  %s1957_s26 = sphi %s2049_s26, %s2427_s26   ;;  %s1953_s25 = sphi %s2047_s25, %s2433_s25   ;;  %s1949_s24 = sphi %s2045_s24, %s2425_s24   ;;  %s1945_s23 = sphi %s2043_s23, %s2424_s23   ;;  %s1941_s22 = sphi %s2041_s22, %s2423_s22   ;;  %s1937_s21 = sphi %s2039_s21, %s2432_s21   ;;  %s1933_s20 = sphi %s2037_s20, %s2431_s20   ;;  %s1929_s19 = sphi %s2035_s19, %s2430_s19   ;;  %s1925_s18 = sphi %s2033_s18, %s2429_s18   ;;  %s1921_s17 = sphi %s2031_s17, %s2428_s17  }
  0x14   : > { %2396 = sst [smem:[#allocation10_spill]] %s1941_s22  ;;  %s1528_s29 = sadd.s32 4294967294, %s1961_s27  }
  0x15   : > { %2397 = sst [smem:[#allocation11_spill]] %s1953_s25  ;;  %s37_s30 = sadd.s32 1, %s1953_s25 }
  0x16   : > { %2398 = sst [smem:[#allocation12_spill]] %s1957_s26  ;;  %s40_s12 = sadd.s32 1, %s1957_s26 }
  0x17   : > { %p38_p0 = scmp.ge.s32.totalorder %s37_s30, 2  ;;  %s302_s13 = sadd.s32 1, %s1941_s22 }
  0x18   : > { %p312_p1 = scmp.ne.s32.totalorder %s1941_s22, %s1937_s21  ;;  %p2093_p2 = scmp.eq.s32.totalorder %s1527_s28, 3 }
  0x19   : > { %s2435_s30 = smov (%p38_p0, %s37_s30), 0  ;;  %s2437_s12 = smov (!%p38_p0, %s40_s12), %s1957_s26 }
  0x1a   : > { %2400 = sst [smem:[#allocation13_spill]] %s2435_s30  ;;  %p2102_p3 = por %p2093_p2, %p312_p1 }
  0x1b   : > { %p318_p4 = scmp.ne.s32.totalorder %s1937_s21, %s1933_s20  ;;  %p42_p5 = scmp.ge.s32.totalorder %s2437_s12, 2 }
  0x1c   : > { %s2401_s15 = scalar_select %p2102_p3, 1, 0 }
  0x1d   : > { %p2108_p6 = scmp.eq.s32.totalorder %s1528_s29, 3  ;;  %s326_s28 = ssub.s32 %s1953_s25, %s2435_s30 }
  0x1e   : > { %2402 = sst [smem:[#allocation14_spill]] %s2401_s15  ;;  %s330_s11 = sadd.s32 1, %s1929_s19 }
  0x1f   : > { %s2439_s12 = smov (%p42_p5, %s2437_s12), 0  ;;  %p2119_p7 = por %p2108_p6, %p318_p4 }
  0x20   : > { %2404 = sst [smem:[#allocation15_spill]] %s2439_s12  ;;  %p340_p8 = scmp.ne.s32.totalorder %s1929_s19, %s1925_s18 }
  0x21   : > { %s299_s20 = ssub.s32 %s1957_s26, %s2439_s12  ;;  %p346_p9 = scmp.ne.s32.totalorder %s1925_s18, %s1921_s17 }
  0x22   : > { %p300_p10 = scmp.eq.s32.totalorder %s299_s20, 0  ;;  %s327_s29 = sor.u32 %s326_s28, %s299_s20 }
  0x23   : > { %p328_p11 = scmp.eq.s32.totalorder %s327_s29, 0  ;;  %p2131_p12 = por %p340_p8, %p2093_p2 }
  0x24   : > { %s2136_s30 = scalar_select %p300_p10, %s1941_s22, %s302_s13  }
  0x25   : > { %s2139_s25 = scalar_select %p328_p11, %s1929_s19, %s330_s11  }
  0x26   : > { %2407 = sst [smem:[#allocation16_spill]] %s2136_s30  ;;  %p2143_p13 = por %p346_p9, %p2108_p6 }
  0x27   : > { %p1531_p0 = scmp.ge.s32.totalorder %s1961_s27, 1  ;;  %p432_p1 = scmp.lt.s32.totalorder %s1961_s27, 5 }
  0x29   : > { %p433_p4 = pnand %p1531_p0, %p432_p1 }
  0x2a   : > { %p517_p2 = scmp.lt.s32.totalorder (!%p433_p4), %s1945_s23, 1  ;;  %s2381_s20 = sand.u32 (!%p433_p4), 1, %s1937_s21   ;;  %v1963_v0 = vmov (!%p433_p4), 0.0|0.0   ;;  %vm1964_vm0 = vmmov (!%p433_p4), 0   ;;  %v1965_v1 = vmov (!%p433_p4), 0.0   ;;  %vm560_vm1 = vcmask (!%p433_p4), 261120  }
  0x2b   : > { %436 = sbr.rel (%p433_p4) target bundleno = 1846 (0x736), region = 60  ;;  %1677 = vmatprep.subr.bf16.mxu1 (!%p433_p4), %v1963_v0  ;;  %s2154_s11 = sshll.u32 (!%p433_p4), %s2381_s20, 3  ;;  %1671 = vmatprep.subr.bf16.mxu0 (!%p433_p4), %v1963_v0  ;;  %vm803_vm2 = vcmask (!%p433_p4), 130048   ;;  %vm880_vm3 = vcmask (!%p433_p4), 64512  }
  0x2c   : > { %p509_p5 = scmp.lt.s32.totalorder (!%p433_p4), %s1949_s24, 1  ;;  %1623 = vmatprep.mubr.msk.f32.mxu1 (!%p433_p4), %vm1964_vm0, %v1965_v1  ;;  %1612 = vmatprep.mubr.msk.f32.mxu0 (!%p433_p4), %vm1964_vm0, %v1965_v1  ;;  %s2409_s4 = sld [smem:[#allocation21_spill]] (!%p433_p4) }
  0x2d   : > { %s2410_s2 = sld [smem:[#allocation19_spill]] (!%p433_p4)  ;;  %s2411_s1 = sld [smem:[#allocation18_spill]] (!%p433_p4) }
  0x2e   : > { %s2412_s0 = sld [smem:[#allocation17_spill]] (!%p433_p4)  ;;  %s2413_s5 = sld [smem:[#allocation22_spill]] (!%p433_p4) }
  0x2f   : > { %s2414_s3 = sld [smem:[#allocation20_spill]] (!%p433_p4)  ;;  %p1559_p6 = scmp.ne.s32.totalorder (!%p433_p4), %s1945_s23, 0 }
  0x32   : > { %s2159_s13 = scalar_select %p517_p2, %s1945_s23, 1 }
  0x33   : > { %s510_s30 = scalar_select %p509_p5, %s1949_s24, 1 }
  0x34   : > { %s2166_s14 = sshll.u32 %s2159_s13, 5  ;;  %s540_s12 = scalar_lea.vmem %s2369_s7, %s2159_s13 }
  0x35   : > { %s529_s29 = scalar_lea.vmem %s2409_s4, %s2166_s14  ;;  %s521_s26 = scalar_lea.vmem %s2410_s2, %s2166_s14  ;;  %v1548_v38 = vld [vmem:[%s540_s12] ss:$0 sm:$0xff] }
  0x36   : > { %v634_v2 = vld [vmem:[%s529_s29] sm:$0xff]  ;;  %v635_v3 = vld [vmem:[%s529_s29 + $0x8] sm:$0xff]  ;;  %v636_v7 = vld [vmem:[%s529_s29 + $0x10] sm:$0xff]  ;;  %s1534_s22 = sshll.u32 %s510_s30, 3  ;;  %s532_s30 = scalar_lea.vmem %s2413_s5, %s2159_s13 }
  0x37   : > { %v549_v4 = vld [vmem:[%s521_s26] sm:$0xff]  ;;  %v1678_v5 = vpack.c.bf16 %v635_v3, %v634_v2  ;;  %v550_v6 = vld [vmem:[%s521_s26 + $0x8] sm:$0xff]  ;;  %v637_v8 = vld [vmem:[%s529_s29 + $0x18] sm:$0xff]  ;;  %s516_s16 = scalar_lea.vmem %s2411_s1, %s1534_s22  ;;  %s512_s2 = scalar_lea.vmem %s2412_s0, %s1534_s22 }
  0x38   : > { %v1672_v9 = vpack.c.bf16 %v550_v6, %v549_v4  ;;  %v551_v10 = vld [vmem:[%s521_s26 + $0x10] sm:$0xff]  ;;  %v552_v11 = vld [vmem:[%s521_s26 + $0x18] sm:$0xff]  ;;  %v1681_v12 = vpack.c.bf16 %v637_v8, %v636_v7  ;;  %v548_v14 = vld [vmem:[%s516_s16] sm:$0xff]  ;;  %s524_s20 = scalar_lea.vmem %s2414_s3, %s2159_s13  ;;  %s1966_s16 = smov 112  }
  0x39   : > { %1679 = vmatpush3.bf16.msra.mxu1 %v1678_v5  ;;  %v1675_v13 = vpack.c.bf16 %v552_v11, %v551_v10  ;;  %v547_v15 = vld [vmem:[%s512_s2] sm:$0xff]  ;;  %s537_s22 = scalar_lea.vmem %s2368_s6, %s2166_s14  ;;  %s2385_s2 = sand.u32 1, %s1925_s18  }
  0x3a   : > { %1673 = vmatpush3.bf16.msra.mxu0 %v1672_v9  ;;  %1680 = vmatprep.subr.bf16.mxu1 %v1963_v0  ;;  %v1546_v16 = vld [vmem:[%s532_s30] ss:$0 sm:$0xff]  ;;  %v719_v25 = vld [vmem:[%s537_s22 + $0x8] sm:$0xff]  ;;  %v720_v26 = vld [vmem:[%s537_s22 + $0x10] sm:$0xff]  ;;  %s545_s29 = scalar_lea.vmem %s2370_s8, %s2166_s14  ;;  %s501_s14 = scalar_lea.vmem [#allocation3], %s2154_s11 }
  0x3b   : > { %1674 = vmatprep.subr.bf16.mxu0 %v1963_v0  ;;  %v1544_v17 = vld [vmem:[%s524_s20] ss:$0 sm:$0xff]  ;;  %v721_v28 = vld [vmem:[%s537_s22 + $0x18] sm:$0xff]  ;;  %s1533_s20 = sshll.u32 %s2385_s2, 4  ;;  %v801_v56 = vld [vmem:[%s545_s29 + $0x10] sm:$0xff]  ;;  %s2415_s30 = sld [smem:[#allocation23_spill]] (!%p1559_p6) }
  0x3c   : > { %v718_v24 = vld [vmem:[%s537_s22] sm:$0xff]  ;;  %v1687_v29 = vpack.c.bf16 %v721_v28, %v720_v26  ;;  %v802_v57 = vld [vmem:[%s545_s29 + $0x18] sm:$0xff]  ;;  %v800_v63 = vld [vmem:[%s545_s29 + $0x8] sm:$0xff] }
  0x3d   : > { %1682 = vmatpush3.bf16.msra.mxu1 %v1681_v12  ;;  %v1684_v27 = vpack.c.bf16 %v719_v25, %v718_v24  ;;  %v1690_v58 = vpack.c.bf16 %v802_v57, %v801_v56  ;;  %v799_v62 = vld [vmem:[%s545_s29] sm:$0xff] }
  0x3e   : > { %1676 = vmatpush3.bf16.msra.mxu0 %v1675_v13  ;;  %1637 = vmatprep.subr.mxu1 %v1965_v1  ;;  %v1693_v2 = vpack.c.bf16 %v800_v63, %v799_v62 }
  0x3f   : > { %1683 = vmatprep.subr.bf16.mxu0 %v1963_v0 }
  0x40   : > { %1624 = vmatmul.mubr.msk.f32.vlgmr.msra.gmra.mrb[0].mxu1 %vm560_vm1, %v548_v14 }
  0x41   : > { %1613 = vmatmul.mubr.msk.f32.vlgmr.msra.gmra.mrb[0].mxu0 %vm560_vm1, %v547_v15  ;;  %1639 = vmatprep.mubr.msk.f32.mxu1 %vm1964_vm0, %v1965_v1  ;;  %v1560_v6 = vld [vmem:[%s2415_s30] ss:$0 sm:$0xff] (!%p1559_p6) }
  0x42   : > { %1634 = vmatprep.mubr.msk.f32.mxu0 %vm1964_vm0, %v1965_v1  ;;  %1685 = vmatpush3.bf16.msra.mxu0 %v1684_v27 }
  0x43   : > { %1686 = vmatprep.subr.bf16.mxu0 %v1963_v0 }
  0x46   : > { %1688 = vmatpush3.bf16.msra.mxu0 %v1687_v29 }
  0x47   : > { %1689 = vmatprep.subr.bf16.mxu0 %v1963_v0 }
  0x49   : > { %1635 = vmatmul.mubr.msk.f32.vlgmr.msra.gmra.mrb[2].mxu0 %vm560_vm1, %v548_v14 }
  0x4a   : > { %1661 = vmatprep.mubr.msk.f32.mxu0 %vm1964_vm0, %v1965_v1  ;;  %1691 = vmatpush3.bf16.msra.mxu0 %v1690_v58 }
  0x4b   : > { %1692 = vmatprep.subr.bf16.mxu0 %v1963_v0 }
 0x113   : > { %v714_v18 = vpop.f32.mrb[0].mxu1 }
 0x114   : > { %v715_v19 = vadd.f32 %v1546_v16, %v714_v18  ;;  %v1625_v20 = vpop.f32.mrb[1].mxu1  ;;  %v630_v21 = vpop.f32.mrb[0].mxu0 }
 0x115   : > { %v631_v22 = vadd.f32 %v1544_v17, %v630_v21  ;;  %v1614_v23 = vpop.f32.mrb[1].mxu0 }
 0x116   : > { %1638 = vmatpush3.xpose.msk.msra.mxu1 %vm803_vm2, %v715_v19 }
 0x117   : > { %966 = vrot.lane.b32.xlu1 %v631_v22, %s1966_s16  ;;  %1642 = vmatprep.subr.mxu1 %v1965_v1  ;;  %s2225_s16 = scalar_lea.vmem [#allocation5], %s1533_s20 }
 0x119   : > { %1640 = vmatmul.mubr.msk.f32.vlgmr.msra.gmra.mrb[2].mxu1 %vm803_vm2, %v631_v22 }
 0x11a   : > { %1644 = vmatprep.mubr.msk.f32.mxu1 %vm1964_vm0, %v1965_v1 }
 0x11c   : > { %v795_v39 = vpop.f32.mrb[2].mxu0 }
 0x11d   : > { %v796_v40 = vadd.f32 %v1548_v38, %v795_v39  ;;  %v1636_v41 = vpop.f32.mrb[3].mxu0 }
 0x11f   : > { %1643 = vmatpush3.msra.mxu1 %v796_v40 }
 0x120   : > { %1647 = vmatprep.subr.mxu1 %v1965_v1 }
 0x189   : > { %v967_v45 = vpop.permute.xlu1 %966 }
 0x1ec   : > { %v876_v30 = vpop.f32.mrb[2].mxu1 }
 0x1ed   : > { %v1641_v31 = vpop.f32.mrb[3].mxu1  ;;  %v881_v32 = vsel %vm880_vm3, %v876_v30, -inf }
 0x1ee   : > { %882 = vmax.xlane.f32.xlu0 %v881_v32 }
 0x27b   : > { %v883_v33 = vpop.xlane.xlu0 %882 }
 0x27c   : > { %v884_v34 = vsub.f32 %v876_v30, %v883_v33 }
 0x27e   : > { %v885_v35 = vmul.f32 1.442695, %v884_v34 }
 0x280   : > { %1803 = vpow2.f32 %v885_v35 }
 0x28a   : > { %v1804_v36 = vpop.eup %1803 }
 0x28b   : > { %v887_v37 = vsel %vm880_vm3, %v1804_v36, 0.0 }
 0x28c   : > { %888 = vadd.xlane.f32.xlu0 %v887_v37 }
 0x319   : > { %v889_v42 = vpop.xlane.xlu0 %888 }
 0x31a   : > { %1805 = vrcp.f32 %v889_v42 }
 0x324   : > { %v1806_v43 = vpop.eup %1805 }
 0x325   : > { %v891_v44 = vmul.f32 %v1806_v43, %v1804_v36 }
 0x327   : > { %892 = vst.msk [vmem:[%s2225_s16] sm:$0xff] %vm880_vm3, %v891_v44  ;;  %1645 = vmatmul.mubr.msk.f32.vlgmr.msra.gmra.mrb[4].mxu1 %vm880_vm3, %v891_v44 }
 0x328   : > { %1648 = vmatpush3.xpose.msk.msra.mxu1 %vm803_vm2, %v715_v19  ;;  %1649 = vmatprep.mubr.msk.f32.mxu1 %vm1964_vm0, %v1965_v1 }
 0x329   : > { %1652 = vmatprep.subr.mxu1 %v1965_v1 }
 0x32b   : > { %1650 = vmatmul.mubr.msk.f32.vlgmr.msra.gmra.mrb[6].mxu1 %vm803_vm2, %v967_v45 }
 0x32c   : > { %1653 = vmatpush3.msra.mxu1 %v796_v40  ;;  %1654 = vmatprep.mubr.msk.f32.mxu1 %vm1964_vm0, %v1965_v1 }
 0x3fa   : > { %v962_v46 = vpop.f32.mrb[4].mxu1 }
 0x3fb   : > { %v1646_v47 = vpop.f32.mrb[5].mxu1 }
 0x3fe   : > { %v1036_v48 = vpop.f32.mrb[6].mxu1 }
 0x3ff   : > { %v1651_v49 = vpop.f32.mrb[7].mxu1  ;;  %v1040_v50 = vsel %vm880_vm3, %v1036_v48, -inf }
 0x400   : > { %1041 = vmax.xlane.f32.xlu1 %v1040_v50 }
 0x48d   : > { %v1042_v51 = vpop.xlane.xlu1 %1041 }
 0x48e   : > { %v1043_v52 = vsub.f32 %v1036_v48, %v1042_v51 }
 0x490   : > { %v1044_v53 = vmul.f32 1.442695, %v1043_v52 }
 0x492   : > { %1807 = vpow2.f32 %v1044_v53 }
 0x49c   : > { %v1808_v54 = vpop.eup %1807 }
 0x49d   : > { %v1046_v55 = vsel %vm880_vm3, %v1808_v54, 0.0 }
 0x49e   : > { %1047 = vadd.xlane.f32.xlu0 %v1046_v55 }
 0x52b   : > { %v1048_v59 = vpop.xlane.xlu0 %1047 }
 0x52c   : > { %1809 = vrcp.f32 %v1048_v59 }
 0x536   : > { %v1810_v60 = vpop.eup %1809 }
 0x537   : > { %v1050_v61 = vmul.f32 %v1810_v60, %v1808_v54 }
 0x539   : > { %1555 = vst.msk [vmem:[%s2225_s16 + $0x8] sm:$0xff] %vm880_vm3, %v1050_v61  ;;  %1655 = vmatmul.mubr.msk.f32.vlgmr.msra.gmra.mrb[8].mxu1 %vm880_vm3, %v1050_v61 }
 0x60c   : > { %v1122_v3 = vpop.f32.mrb[8].mxu1 }
 0x60d   : > { %v1656_v4 = vpop.f32.mrb[9].mxu1  ;;  %1662 = vmatmul.mubr.msk.f32.vlgmr.msra.gmra.mrb[4].mxu0 %vm803_vm2, %v1122_v3 }
 0x60e   : > { %1694 = vmatpush3.bf16.msra.mxu0 %v1693_v2  ;;  %1668 = vmatprep.mubr.msk.f32.mxu0 %vm1964_vm0, %v1965_v1 }
 0x615   : > { %1669 = vmatmul.mubr.msk.f32.vlgmr.msra.gmra.mrb[4].mxu0 %vm803_vm2, %v962_v46 }
 0x6e3   : > { %1275 = sbr.rel (%p1559_p6) target bundleno = 1772 (0x6ec), region = 64 }
 0x6e8   : > { %v1268_v0 = vpop.f32.mrb[4].mxu0 }
 0x6e9   : > { %v1670_v5 = vpop.f32.mrb[5].mxu0  ;;  %v1283_v7 = vadd.f32 (!%p1559_p6), %v1560_v6, %v1268_v0 }
 0x6eb   : > { %1284 = vst.msk [vmem:[#allocation2] sm:$0xff] %vm560_vm1, %v1283_v7 }
 0x6ec PF: > { %p1561_p8 = scmp.le.s32.totalorder %s1945_s23, 0 }
 0x6ee   : > { %1288 = sbr.rel (%p1561_p8) target bundleno = 1782 (0x6f6), region = 68 }
 0x6f2   : > { %v1289_v1 = vld [vmem:[#allocation2] sm:$0xff] (!%p1561_p8) }
 0x6f3   : > { %v1290_v8 = vadd.f32 (!%p1561_p8), %v1289_v1, %v1268_v0 }
 0x6f5   : > { %1291 = vst.msk [vmem:[#allocation2] sm:$0xff] %vm560_vm1, %v1290_v8 }
 0x6f6 PF: > { %p1562_p9 = scmp.ne.s32.totalorder %s1945_s23, 1 }
 0x6f8   : > { %1295 = sbr.rel (%p1562_p9) target bundleno = 1791 (0x6ff), region = 72 }
 0x6fc   : > { %v1296_v9 = vld [vmem:[#allocation2] sm:$0xff] (!%p1562_p9) }
 0x6fd   : > { %1297 = vst.msk [vmem:[%s501_s14] sm:$0xff] (!%p1562_p9), %vm560_vm1, %v1296_v9 }
 0x6ff PF: > { %s1565_s12 = sshll.u32 %s1949_s24, 7  ;;  %s2417_s28 = sld [smem:[#allocation24_spill]] }
 0x700   : > { %s1317_s22 = sshll.u32 %s501_s14, 4  ;;  %s2418_s26 = sand.u32 1, %s1937_s21   ;;  %s1318_s22 = int_to_ptr.vmem [resolvable:$true] %s1317_s22 }
 0x701   : > { %s1299_s30 = scalar_lea.sflag [#allocation4], %s2418_s26  ;;  %s1811_s2 = scalar_lea.vmem %s1318_s22, 128 }
 0x702   : > { %p1812_p10 = scmp.ne.s32.totalorder %s1318_s22, %s1811_s2  ;;  %s1967_s0 = smov [#allocation3]  }
 0x703   : > { %s1815_s1 = sshll.u32 %s1967_s0, 4  ;;  %s1816_s1 = int_to_ptr.vmem [resolvable:$false] %s1815_s1 }
 0x704   : > { %p1813_p11 = pnand %p1812_p10, %p2102_p3  ;;  %s1817_s3 = scalar_lea.vmem %s1816_s1, 256 }
 0x705   : > { %s2265_s29 = scalar_lea.hbm %s2417_s28, %s1565_s12  ;;  %p1818_p1 = scmp.lt.s32.totalorder %s1318_s22, %s1816_s1 }
 0x706   : > { %p1814_p0 = pneg %p1813_p11  ;;  %p1819_p4 = scmp.lt.s32.totalorder %s1817_s3, %s1811_s2 }
 0x708   : > { %p1820_p2 = por %p1819_p4, %p1818_p1 }
 0x70a   : > { %p1821_p5 = pnand %p1820_p2, %p1814_p0 }
 0x70c   : > { %1824 = shalt.err (!%p1821_p5)
}
 0x70d   : > { %s1825_s14 = scalar_lea.hbm %s2265_s29, 128  ;;  %s1829_s0 = scalar_lea.hbm %s2417_s28, 256 }
 0x70e   : > { %p1826_p6 = scmp.ne.s32.totalorder %s2265_s29, %s1825_s14  ;;  %p1830_p10 = scmp.lt.u32.totalorder %s2265_s29, %s2417_s28 }
 0x70f   : > { %p1831_p11 = scmp.lt.u32.totalorder %s1829_s0, %s1825_s14  ;;  %p1833_p1 = scmp.lt.u32.totalorder %s1825_s14, %s2265_s29 }
 0x710   : > { %p1827_p8 = pnand %p1826_p6, %p2102_p3 }
 0x711   : > { %p1832_p0 = por %p1831_p11, %p1830_p10 }
 0x712   : > { %p1828_p9 = pneg %p1827_p8 }
 0x713   : > { %p1834_p4 = por %p1833_p1, %p1832_p0 }
 0x715   : > { %p1835_p2 = pnand %p1834_p4, %p1828_p9 }
 0x717   : > { %1838 = shalt.err (!%p1835_p2)
}
 0x718   : > { %1697 = dma.vmem_to_hbm [thread:$0]  (%p2102_p3), %s1318_s22, 128, %s2265_s29, %s1299_s30  }
 0x719   : > { %s1566_s3 = sshll.u32 %s1945_s23, 1  ;;  %s1567_s2 = sshll.u32 %s1949_s24, 2 }
 0x71a   : > { %s1329_s26 = sadd.s32 %s1567_s2, %s1566_s3  ;;  %s1332_s12 = sshll.u32 %s2225_s16, 4  ;;  %s2289_s12 = int_to_ptr.vmem [resolvable:$true] %s1332_s12 }
 0x71b   : > { %s1568_s20 = sshll.u32 %s1329_s26, 7  ;;  %s2419_s13 = sld [smem:[#allocation25_spill]] }
 0x71c   : > { %s2420_s1 = sand.u32 1, %s1925_s18   ;;  %s1839_s5 = scalar_lea.vmem %s2289_s12, 256 }
 0x71d   : > { %s2298_s4 = scalar_lea.sflag [#allocation6], %s2420_s1  ;;  %p1840_p3 = scmp.ne.s32.totalorder %s2289_s12, %s1839_s5 }
 0x71e   : > { %s1968_s23 = smov [#allocation5]  }
 0x71f   : > { %p1841_p5 = pnand %p1840_p3, %p2131_p12  ;;  %s1843_s24 = sshll.u32 %s1968_s23, 4  ;;  %s1844_s24 = int_to_ptr.vmem [resolvable:$false] %s1843_s24 }
 0x720   : > { %s1845_s16 = scalar_lea.vmem %s1844_s24, 512  ;;  %p1846_p8 = scmp.lt.s32.totalorder %s2289_s12, %s1844_s24 }
 0x721   : > { %s2294_s11 = scalar_lea.hbm %s2419_s13, %s1568_s20  ;;  %p1842_p6 = pneg %p1841_p5 }
 0x722   : > { %p1847_p9 = scmp.lt.s32.totalorder %s1845_s16, %s1839_s5 }
 0x724   : > { %p1848_p10 = por %p1847_p9, %p1846_p8 }
 0x726   : > { %p1849_p11 = pnand %p1848_p10, %p1842_p6 }
 0x728   : > { %1852 = shalt.err (!%p1849_p11)
}
 0x729   : > { %s1853_s29 = scalar_lea.hbm %s2294_s11, 256  ;;  %s1857_s3 = scalar_lea.hbm %s2419_s13, 1024 }
 0x72a   : > { %p1854_p0 = scmp.ne.s32.totalorder %s2294_s11, %s1853_s29  ;;  %p1858_p2 = scmp.lt.u32.totalorder %s2294_s11, %s2419_s13 }
 0x72b   : > { %p1859_p3 = scmp.lt.u32.totalorder %s1857_s3, %s1853_s29  ;;  %p1861_p6 = scmp.lt.u32.totalorder %s1853_s29, %s2294_s11 }
 0x72c   : > { %p1855_p1 = pnand %p1854_p0, %p2131_p12 }
 0x72d   : > { %p1860_p5 = por %p1859_p3, %p1858_p2 }
 0x72e   : > { %p1856_p4 = pneg %p1855_p1 }
 0x72f   : > { %p1862_p8 = por %p1861_p6, %p1860_p5 }
 0x731   : > { %p1863_p9 = pnand %p1862_p8, %p1856_p4 }
 0x733   : > { %1866 = shalt.err (!%p1863_p9)
}
 0x734   : > { %s1969_s5 = smov 128   ;;  %s1970_s20 = smov 8  }
 0x735   : > { %1698 = dma.vmem_to_hbm [thread:$0]  (%p2131_p12), %s2289_s12, 256, %s2294_s11, %s2298_s4, %s1969_s5, %s1969_s5, %s1970_s20  }
 0x736 PF: > { %s2421_s14 = sld [smem:[#allocation9_spill]]  ;;  %p1708_p10 = scmp.ge.s32.totalorder %s1961_s27, 2 }
 0x738   : > { %p1702_p11 = pnand %p1708_p10, %p2119_p7 }
 0x73c   : > { %s1347_s0 = sand.u32 1, %s2421_s14  }
 0x73d   : > { %s1348_s1 = scalar_lea.sflag [#allocation4], %s1347_s0 }
 0x73e   : > { %1912 = dma.done.wait (!%p1702_p11), %s1348_s1, 128  }
 0x73f   : > { %1914 = vsyncadd (!%p1702_p11), %s1348_s1, 4294967168  ;;  %s1356_s23 = sand.u32 1, %s1921_s17   ;;  %p1705_p0 = pnand %p1708_p10, %p2143_p13 }
 0x740   : > { %s1357_s24 = scalar_lea.sflag [#allocation6], %s1356_s23 }
 0x741   : > { %1916 = dma.done.wait (!%p1705_p0), %s1357_s24, 256  }
 0x742   : > { %1918 = vsyncadd (!%p1705_p0), %s1357_s24, 4294967040  ;;  %s28_s27 = sadd.s32 1, %s1961_s27   ;;  %s2422_s4 = sld [smem:[#allocation10_spill]] }
 0x743   : > { %p25_p12 = scmp.ge.s32.totalorder %s28_s27, 6   ;;  %s2423_s22 = sld [smem:[#allocation16_spill]] }
 0x744   : > { %s2424_s23 = sld [smem:[#allocation11_spill]]  ;;  %s2425_s24 = sld [smem:[#allocation12_spill]] }
 0x745   : > { %s2426_s10 = sld [smem:[#allocation13_spill]]  ;;  %s2427_s26 = sld [smem:[#allocation15_spill]] }
 0x746   : > { %s2428_s17 = smov %s1925_s18  ;;  %s2429_s18 = smov %s1929_s19 }
 0x747   : > { %s2430_s19 = smov %s2139_s25  ;;  %s2431_s20 = smov %s1937_s21 }
 0x748   : > { %s2432_s21 = smov %s2422_s4  ;;  %27 = sbr.rel (!%p25_p12) target bundleno = 19 (0x13), region = 149 }
 0x74b   : > { %s2433_s25 = smov %s2426_s10 }
 0x74f   :  { %1362 = vsyncpa [#allocation4], 1 }
 0x750   :  { %1364 = vsyncpa [#allocation4 + $0x1], 1 }
 0x751   :  { %1365 = vsyncpa [#allocation6], 1 }
 0x752   :  { %1367 = vsyncpa [#allocation6 + $0x1], 1 }

</bundles_post_ra>
